<compile_context>
chip_gen: v6e
topology: v6e:2x2x1
jax: 0.10.0
libtpu: 0.0.40
codegen_flags: <defaults>
</compile_context>

<pallas_src>
import functools
import math

import jax
import jax.numpy as jnp
from jax.experimental import pallas as pl
from jax.experimental.pallas import tpu as pltpu

# ---- small synthetic config (module hyper-params) ----
HIDDEN = 32          # transformer.d_model
NUM_CLASSES = 16
NUM_QUERIES = 8
BATCH = 2
DEC_LAYERS = 2       # number of stacked decoder-layer outputs in hs
GROUP_DETR = 1

MAX_TILE_M = 2048    # row-tile cap (amortizes ~0.35us/step grid overhead; VMEM use stays ~10 MiB)


def _round_up(n, m):
    return ((n + m - 1) // m) * m


def _layout(hidden, num_classes):
    """Lane/row layout of the fused head, valid for any (hidden, num_classes).

    Output / intermediate slab columns (width n_slab, a multiple of 128):
      [0, C)               : class logits
      [C, C+4)             : box deltas / decoded boxes (ref is placed here in y1)
      [feat_off, feat_off+H): bbox-MLP hidden activations (pre/post ReLU)
    Weight slab rows (bf16):
      [0, H)               : fused stage-1 weights  (Wc -> cols [0,C), W1 -> cols [feat_off,.))
      [r1, r1+n_slab)      : W2 (nonzero rows = h1 columns)
      [r2, r2+n_slab)      : W3 (nonzero rows = h2 columns, nonzero cols = [C, C+4))
    """
    H, C = hidden, num_classes
    feat_off = _round_up(C + 4, 8)
    n_slab = _round_up(feat_off + H, 128)
    r1 = _round_up(H, 16)                 # bf16 packs 16 sublanes per vreg
    r2 = r1 + n_slab
    rows = r2 + n_slab
    return feat_off, n_slab, r1, r2, rows


def _head_kernel(x_ref, r_ref, w_ref, c_ref, out_ref, *, hidden, row_w2, row_w3, n_slab):
    """One row-tile of the LWDETR head.

    x_ref  : (TM, H)  bf16   decoder hidden states (natural shape)
    r_ref  : (TM, 8)  f32    ref_unsigmoid in cols [0,4), zeros in [4,8)
    w_ref  : (rows, n_slab) bf16  all weights (see _layout)
    c_ref  : (16, n_slab)   f32   row0=b1|bc, row1=b2, row2=b3, row3=mask_cls,
                                  row4=mask_box, rows 8..15 = ref placement matrix
    out_ref: (TM, n_slab)   f32   logits at [0,C), boxes at [C,C+4), zeros elsewhere
    """
    H = hidden
    x = x_ref[...]                                  # (TM, H)  bf16
    r = r_ref[...]                                  # (TM, 8)  f32

    b1c = c_ref[0:1, :]
    b2 = c_ref[1:2, :]
    b3 = c_ref[2:3, :]
    mask_cls = c_ref[3:4, :]
    mask_box = c_ref[4:5, :]
    place = c_ref[8:16, :]                          # (8, n_slab) ref -> cols [C, C+4)

    # Fused stage 1: class logits at cols [0,C), pre-ReLU h1 at cols [feat_off,.), and ref
    # placed (in f32) at cols [C, C+4) — one bf16 MXU matmul + one tiny f32 placement matmul.
    y1 = (jnp.dot(x, w_ref[0:H, :], preferred_element_type=jnp.float32)
          + jnp.dot(r, place, preferred_element_type=jnp.float32)
          + b1c)
    h1 = jnp.maximum(y1, 0.0)                       # ReLU; non-hidden cols hit zero W2 rows

    # Stage 2 of bbox MLP (bf16 operands, f32 accumulate).
    y2 = jnp.dot(h1.astype(jnp.bfloat16), w_ref[row_w2:row_w2 + n_slab, :],
                 preferred_element_type=jnp.float32) + b2
    h2 = jnp.maximum(y2, 0.0)

    # Stage 3: delta lands at cols [C, C+4).
    delta = jnp.dot(h2.astype(jnp.bfloat16), w_ref[row_w3:row_w3 + n_slab, :],
                    preferred_element_type=jnp.float32) + b3

    # bbox_reparam=False: boxes = sigmoid(delta + ref). ref already sits at cols [C,C+4) of y1.
    boxes = jax.nn.sigmoid(delta + y1)

    # Single lane-dense store; dead lanes are exactly zero (both masks are 0 there).
    out_ref[...] = mask_cls * y1 + mask_box * boxes


def pack_head_params(params, hidden, num_classes):
    """Pack head weights/biases/masks into two constant blocks (done once, off the hot path)."""
    H, C = hidden, num_classes
    feat_off, n_slab, r1, r2, rows = _layout(H, C)

    w = jnp.zeros((rows, n_slab), jnp.float32)
    w = w.at[0:H, 0:C].set(params["wc"])
    w = w.at[0:H, feat_off:feat_off + H].set(params["w1"])
    w = w.at[r1 + feat_off:r1 + feat_off + H, feat_off:feat_off + H].set(params["w2"])
    w = w.at[r2 + feat_off:r2 + feat_off + H, C:C + 4].set(params["w3"])
    w = w.astype(jnp.bfloat16)

    c = jnp.zeros((16, n_slab), jnp.float32)
    c = c.at[0, 0:C].set(params["bc"].reshape(-1))
    c = c.at[0, feat_off:feat_off + H].set(params["b1"].reshape(-1))
    c = c.at[1, feat_off:feat_off + H].set(params["b2"].reshape(-1))
    c = c.at[2, C:C + 4].set(params["b3"].reshape(-1))
    c = c.at[3, 0:C].set(1.0)                             # mask_cls
    c = c.at[4, C:C + 4].set(1.0)                         # mask_box
    for j in range(4):                                    # placement matrix: ref[:, j] -> col C+j
        c = c.at[8 + j, C + j].set(1.0)

    return {"w": w, "c": c}


@functools.partial(jax.jit, static_argnames=("num_classes",))
def lwdetr_head_pallas(hs, ref_unsigmoid, packed, *, num_classes):
    """hs: (L,B,Q,H), ref_unsigmoid: (L,B,Q,4) -> LWDETR.forward output (aux_loss=False)."""
    L, B, Q, H = hs.shape
    C = num_classes
    feat_off, n_slab, r1, r2, rows = _layout(H, C)

    # aux_loss=False default: only the last decoder layer's predictions are produced (L x less work).
    M = B * Q
    m_pad = _round_up(M, 16)                  # bf16 sublane packing => multiples of 16
    tile_m = min(MAX_TILE_M, m_pad)
    m_pad = _round_up(m_pad, tile_m)

    x = hs[-1].reshape(M, H).astype(jnp.bfloat16)                 # natural shape, bf16 operand
    r = ref_unsigmoid[-1].reshape(M, 4).astype(jnp.float32)       # keep ref in f32
    x = jnp.pad(x, ((0, m_pad - M), (0, 0)))
    r = jnp.pad(r, ((0, m_pad - M), (0, 4)))                      # pad lanes 4->8 for a clean dot

    grid = (m_pad // tile_m,)
    kernel = functools.partial(_head_kernel, hidden=H, row_w2=r1, row_w3=r2, n_slab=n_slab)

    out = pl.pallas_call(
        kernel,
        out_shape=jax.ShapeDtypeStruct((m_pad, n_slab), jnp.float32),
        grid=grid,
        in_specs=[
            pl.BlockSpec((tile_m, H), lambda i: (i, 0)),          # hs rows (full last dim)
            pl.BlockSpec((tile_m, 8), lambda i: (i, 0)),          # ref rows (full last dim)
            pl.BlockSpec(packed["w"].shape, lambda i: (0, 0)),    # all weights: one DMA
            pl.BlockSpec(packed["c"].shape, lambda i: (0, 0)),    # biases+masks+placement: one DMA
        ],
        out_specs=pl.BlockSpec((tile_m, n_slab), lambda i: (i, 0)),
        compiler_params=pltpu.CompilerParams(dimension_semantics=("parallel",)),
    )(x, r, packed["w"], packed["c"])

    # Sliced inside the same jit so XLA fuses the copies with the kernel's consumers.
    logits = out[:M, :C].reshape(B, Q, C)
    boxes = out[:M, C:C + 4].reshape(B, Q, 4)
    return {"pred_logits": logits, "pred_boxes": boxes}


def init_params(key, *, zero_last_layer=True):
    """Parameter init mirroring LWDETR.__init__ (zero_last_layer=False exercises the full MLP path)."""
    ks = jax.random.split(key, 10)

    def linear_w(k, fan_in, fan_out):
        bound = 1.0 / math.sqrt(fan_in)
        return jax.random.uniform(k, (fan_in, fan_out), jnp.float32, -bound, bound)

    def linear_b(k, fan_in, fan_out):
        bound = 1.0 / math.sqrt(fan_in)
        return jax.random.uniform(k, (1, fan_out), jnp.float32, -bound, bound)

    H, C = HIDDEN, NUM_CLASSES
    params = {
        "w1": linear_w(ks[0], H, H), "b1": linear_b(ks[1], H, H),
        "w2": linear_w(ks[2], H, H), "b2": linear_b(ks[3], H, H),
        "wc": linear_w(ks[4], H, C),
        "bc": jnp.full((1, C), -math.log((1.0 - 0.01) / 0.01), jnp.float32),
    }
    if zero_last_layer:   # nn.init.constant_(bbox_embed.layers[-1].{weight,bias}, 0)
        params["w3"] = jnp.zeros((H, 4), jnp.float32)
        params["b3"] = jnp.zeros((1, 4), jnp.float32)
    else:
        params["w3"] = linear_w(ks[6], H, 4)
        params["b3"] = linear_b(ks[7], H, 4)
    # Embeddings that feed the external transformer (refpoint_embed zero-init per __init__).
    params["refpoint_embed"] = jnp.zeros((NUM_QUERIES * GROUP_DETR, 4), jnp.float32)
    params["query_feat"] = jax.random.normal(ks[8], (NUM_QUERIES * GROUP_DETR, HIDDEN), jnp.float32)
    return params


def _reference(hs, ref, p):
    """Pure-JAX reference for LWDETR.forward head (aux_loss=False, bbox_reparam=False),
    with the same bf16-operand / f32-accumulate matmul numerics as the kernel."""
    f = lambda a: a.astype(jnp.bfloat16).astype(jnp.float32)
    x = hs[-1].astype(jnp.float32)
    h1 = jax.nn.relu(f(x) @ f(p["w1"]) + p["b1"])
    h2 = jax.nn.relu(f(h1) @ f(p["w2"]) + p["b2"])
    delta = f(h2) @ f(p["w3"]) + p["b3"]
    boxes = jax.nn.sigmoid(delta + ref[-1])
    logits = f(x) @ f(p["wc"]) + p["bc"]
    return {"pred_logits": logits, "pred_boxes": boxes}


def _check(out, ref_out):
    assert out["pred_logits"].shape == (BATCH, NUM_QUERIES, NUM_CLASSES)
    assert out["pred_boxes"].shape == (BATCH, NUM_QUERIES, 4)
    assert jnp.allclose(out["pred_logits"], ref_out["pred_logits"], atol=1e-3, rtol=1e-3)
    assert jnp.allclose(out["pred_boxes"], ref_out["pred_boxes"], atol=1e-3, rtol=1e-3)


if __name__ == "__main__":
    key = jax.random.PRNGKey(0)
    k_hs, k_ref, k_p0, k_p1 = jax.random.split(key, 4)

    # Synthetic transformer outputs (see TODO above): hs stacked over decoder layers.
    hs = jax.random.normal(k_hs, (DEC_LAYERS, BATCH, NUM_QUERIES, HIDDEN), jnp.float32)
    ref_unsigmoid = jax.random.normal(k_ref, (DEC_LAYERS, BATCH, NUM_QUERIES, 4), jnp.float32)

    # Check 1: module-faithful init (last bbox layer zero => boxes == sigmoid(ref)).
    params = init_params(k_p0, zero_last_layer=True)
    packed = pack_head_params(params, HIDDEN, NUM_CLASSES)
    out = lwdetr_head_pallas(hs, ref_unsigmoid, packed, num_classes=NUM_CLASSES)
    jax.block_until_ready(out)
    _check(out, _reference(hs, ref_unsigmoid, params))

    # Check 2: random last layer, exercises the full bbox-MLP -> sigmoid path.
    params2 = init_params(k_p1, zero_last_layer=False)
    packed2 = pack_head_params(params2, HIDDEN, NUM_CLASSES)
    out2 = lwdetr_head_pallas(hs, ref_unsigmoid, packed2, num_classes=NUM_CLASSES)
    jax.block_until_ready(out2)
    _check(out2, _reference(hs, ref_unsigmoid, params2))

    print("KERNEL_OK")
</pallas_src>

<mosaic_0001>
module attributes {stable_mosaic.version = 11 : i64} {
  func.func @_head_kernel(%arg0: i32, %arg1: memref<16x32xbf16, #tpu.memory_space<vmem>>, %arg2: memref<16x8xf32, #tpu.memory_space<vmem>>, %arg3: memref<288x128xbf16, #tpu.memory_space<vmem>>, %arg4: memref<16x128xf32, #tpu.memory_space<vmem>>, %arg5: memref<16x128xf32, #tpu.memory_space<vmem>>) attributes {dimension_semantics = [#tpu.dimension_semantics<parallel>], iteration_bounds = array<i64: 1>, scalar_prefetch = 0 : i64, scratch_operands = 0 : i64, tpu.core_type = #tpu.core_type<tc>, window_params = [{transform_indices = @transform_0, window_bounds = array<i64: 16, 32>}, {transform_indices = @transform_1, window_bounds = array<i64: 16, 8>}, {pipeline_mode = #tpu.pipeline_mode<synchronous>, transform_indices = @transform_2, window_bounds = array<i64: 288, 128>}, {pipeline_mode = #tpu.pipeline_mode<synchronous>, transform_indices = @transform_3, window_bounds = array<i64: 16, 128>}, {transform_indices = @transform_4, window_bounds = array<i64: 16, 128>}]} {
    %c0 = arith.constant 0 : index
    %c0_0 = arith.constant 0 : index
    %0 = vector.load %arg1[%c0, %c0_0] : memref<16x32xbf16, #tpu.memory_space<vmem>>, vector<16x32xbf16>
    %c0_1 = arith.constant 0 : index
    %c0_2 = arith.constant 0 : index
    %1 = vector.load %arg2[%c0_1, %c0_2] : memref<16x8xf32, #tpu.memory_space<vmem>>, vector<16x8xf32>
    %c0_3 = arith.constant 0 : index
    %c0_4 = arith.constant 0 : index
    %2 = vector.load %arg4[%c0_3, %c0_4] : memref<16x128xf32, #tpu.memory_space<vmem>>, vector<1x128xf32>
    %c1 = arith.constant 1 : index
    %c0_5 = arith.constant 0 : index
    %3 = vector.load %arg4[%c1, %c0_5] : memref<16x128xf32, #tpu.memory_space<vmem>>, vector<1x128xf32>
    %c2 = arith.constant 2 : index
    %c0_6 = arith.constant 0 : index
    %4 = vector.load %arg4[%c2, %c0_6] : memref<16x128xf32, #tpu.memory_space<vmem>>, vector<1x128xf32>
    %c3 = arith.constant 3 : index
    %c0_7 = arith.constant 0 : index
    %5 = vector.load %arg4[%c3, %c0_7] : memref<16x128xf32, #tpu.memory_space<vmem>>, vector<1x128xf32>
    %c4 = arith.constant 4 : index
    %c0_8 = arith.constant 0 : index
    %6 = vector.load %arg4[%c4, %c0_8] : memref<16x128xf32, #tpu.memory_space<vmem>>, vector<1x128xf32>
    %c8 = arith.constant 8 : index
    %c0_9 = arith.constant 0 : index
    %7 = vector.load %arg4[%c8, %c0_9] : memref<16x128xf32, #tpu.memory_space<vmem>>, vector<8x128xf32>
    %c0_10 = arith.constant 0 : index
    %c0_11 = arith.constant 0 : index
    %8 = vector.load %arg3[%c0_10, %c0_11] : memref<288x128xbf16, #tpu.memory_space<vmem>>, vector<32x128xbf16>
    %cst = arith.constant dense<0.000000e+00> : vector<16x128xf32>
    %9 = tpu.matmul %0, %8, %cst {dimension_numbers = #tpu.dot_dimension_numbers<[1], [0], [0], [1], [0, 0, 1, 1], [], []>} : vector<16x32xbf16>, vector<32x128xbf16>, vector<16x128xf32> -> vector<16x128xf32>
    %cst_12 = arith.constant dense<0.000000e+00> : vector<16x128xf32>
    %10 = tpu.matmul %1, %7, %cst_12 {dimension_numbers = #tpu.dot_dimension_numbers<[1], [0], [0], [1], [0, 0, 1, 1], [], []>} : vector<16x8xf32>, vector<8x128xf32>, vector<16x128xf32> -> vector<16x128xf32>
    %11 = arith.addf %9, %10 : vector<16x128xf32>
    %12 = vector.broadcast %2 : vector<1x128xf32> to vector<16x128xf32>
    %13 = arith.addf %11, %12 : vector<16x128xf32>
    %cst_13 = arith.constant 0.000000e+00 : f32
    %14 = vector.broadcast %cst_13 : f32 to vector<16x128xf32>
    %15 = arith.maximumf %13, %14 : vector<16x128xf32>
    %16 = arith.truncf %15 : vector<16x128xf32> to vector<16x128xbf16>
    %c32 = arith.constant 32 : index
    %c0_14 = arith.constant 0 : index
    %17 = vector.load %arg3[%c32, %c0_14] : memref<288x128xbf16, #tpu.memory_space<vmem>>, vector<128x128xbf16>
    %cst_15 = arith.constant dense<0.000000e+00> : vector<16x128xf32>
    %18 = tpu.matmul %16, %17, %cst_15 {dimension_numbers = #tpu.dot_dimension_numbers<[1], [0], [0], [1], [0, 0, 1, 1], [], []>} : vector<16x128xbf16>, vector<128x128xbf16>, vector<16x128xf32> -> vector<16x128xf32>
    %19 = vector.broadcast %3 : vector<1x128xf32> to vector<16x128xf32>
    %20 = arith.addf %18, %19 : vector<16x128xf32>
    %cst_16 = arith.constant 0.000000e+00 : f32
    %21 = vector.broadcast %cst_16 : f32 to vector<16x128xf32>
    %22 = arith.maximumf %20, %21 : vector<16x128xf32>
    %23 = arith.truncf %22 : vector<16x128xf32> to vector<16x128xbf16>
    %c160 = arith.constant 160 : index
    %c0_17 = arith.constant 0 : index
    %24 = vector.load %arg3[%c160, %c0_17] : memref<288x128xbf16, #tpu.memory_space<vmem>>, vector<128x128xbf16>
    %cst_18 = arith.constant dense<0.000000e+00> : vector<16x128xf32>
    %25 = tpu.matmul %23, %24, %cst_18 {dimension_numbers = #tpu.dot_dimension_numbers<[1], [0], [0], [1], [0, 0, 1, 1], [], []>} : vector<16x128xbf16>, vector<128x128xbf16>, vector<16x128xf32> -> vector<16x128xf32>
    %26 = vector.broadcast %4 : vector<1x128xf32> to vector<16x128xf32>
    %27 = arith.addf %25, %26 : vector<16x128xf32>
    %28 = arith.addf %27, %13 : vector<16x128xf32>
    %29 = arith.negf %28 : vector<16x128xf32>
    %30 = math.exp %29 : vector<16x128xf32>
    %cst_19 = arith.constant 1.000000e+00 : f32
    %31 = vector.broadcast %cst_19 : f32 to vector<16x128xf32>
    %32 = arith.addf %31, %30 : vector<16x128xf32>
    %33 = arith.divf %31, %32 : vector<16x128xf32>
    %34 = vector.broadcast %5 : vector<1x128xf32> to vector<16x128xf32>
    %35 = arith.mulf %34, %13 : vector<16x128xf32>
    %36 = vector.broadcast %6 : vector<1x128xf32> to vector<16x128xf32>
    %37 = arith.mulf %36, %33 : vector<16x128xf32>
    %38 = arith.addf %35, %37 : vector<16x128xf32>
    %c0_20 = arith.constant 0 : index
    %c0_21 = arith.constant 0 : index
    %39 = vector.load %arg5[%c0_20, %c0_21] : memref<16x128xf32, #tpu.memory_space<vmem>>, vector<16x128xf32>
    tpu.vector_store %arg5[%c0_20, %c0_21], %38 {strides = array<i32>} : memref<16x128xf32, #tpu.memory_space<vmem>>, vector<16x128xf32>,
    return
  }
  func.func @transform_0(%arg0: i32) -> (i32, i32) {
    %c0_i32 = arith.constant 0 : i32
    %c0_i32_0 = arith.constant 0 : i32
    return %arg0, %c0_i32 : i32, i32
  }
  func.func @transform_1(%arg0: i32) -> (i32, i32) {
    %c0_i32 = arith.constant 0 : i32
    %c0_i32_0 = arith.constant 0 : i32
    return %arg0, %c0_i32 : i32, i32
  }
  func.func @transform_2(%arg0: i32) -> (i32, i32) {
    %c0_i32 = arith.constant 0 : i32
    %c0_i32_0 = arith.constant 0 : i32
    %c0_i32_1 = arith.constant 0 : i32
    return %c0_i32, %c0_i32_0 : i32, i32
  }
  func.func @transform_3(%arg0: i32) -> (i32, i32) {
    %c0_i32 = arith.constant 0 : i32
    %c0_i32_0 = arith.constant 0 : i32
    %c0_i32_1 = arith.constant 0 : i32
    return %c0_i32, %c0_i32_0 : i32, i32
  }
  func.func @transform_4(%arg0: i32) -> (i32, i32) {
    %c0_i32 = arith.constant 0 : i32
    %c0_i32_0 = arith.constant 0 : i32
    return %arg0, %c0_i32 : i32, i32
  }
}

</mosaic_0001>

<bundles_post_ra>
// kernel: lwdetr_head_pallas.1
= control target key start
LH: loop header
LB: loop body
LE: loop exit
PB: predicated region body
PF: predicated region fallthrough
CT: control target
= control target key end

     0   :  { %9 = vsyncpa [#allocation3], 0  ;;  %s615_s15 = smov [#allocation2]   ;;  %s705_s0 = inlined_call_operand.vmem [shape: bf16[16,32], index: 0, kind: input, shape index: {}]   ;;  %s706_s1 = inlined_call_operand.vmem [shape: f32[16,8], index: 1, kind: input, shape index: {}]   ;;  %s707_s2 = inlined_call_operand.hbm [shape: bf16[288,128], index: 2, kind: input, shape index: {}]   ;;  %s708_s3 = inlined_call_operand.vmem [shape: f32[16,128], index: 3, kind: input, shape index: {}]   ;;  %s709_s4 = inlined_call_operand.vmem [shape: f32[16,128], index: 4, kind: output, shape index: {}]  }
   0x1   :  { %s19_s16 = sshll.u32 %s615_s15, 4  ;;  %s20_s16 = int_to_ptr.vmem [resolvable:$true] %s19_s16 }
   0x2   :  { %s601_s17 = scalar_lea.vmem %s20_s16, 2304  ;;  %p606_p1 = scmp.lt.s32.totalorder %s20_s16, %s20_s16 }
   0x3   :  { %p602_p0 = scmp.ne.s32.totalorder %s20_s16, %s601_s17  ;;  %p607_p2 = scmp.lt.s32.totalorder %s601_s17, %s601_s17 }
   0x5   :  { %p608_p3 = por %p607_p2, %p606_p1 }
   0x7   :  { %p609_p4 = pnand %p608_p3, %p602_p0 }
   0x9   :  { %612 = shalt.err (!%p609_p4)
}
   0xa   :  { %s616_s18 = smov 64   ;;  %s617_s19 = smov 4  }
   0xb   :  { %25 = dma.hbm_to_vmem [thread:$0]  %s707_s2, 2304, %s20_s16, [#allocation3], %s616_s18, %s616_s18, %s617_s19  }
   0xc   :  { %613 = dma.done.wait [#allocation3], 2304  }
   0xd   :  { %614 = vsyncadd [#allocation3], 4294964992  ;;  %v618_v0 = vmov 0.0   ;;  %vm619_vm0 = vmmov 0   ;;  %v566_v1 = vld [vmem:[#allocation2 + $0x8] sm:$0xff]   ;;  %v34_v3 = vld [vmem:[%s706_s1] sm:$0xff] }
   0xe   :  { %513 = vmatprep.subr.bf16.mxu1 %v618_v0  ;;  %517 = vmatprep.mubr.msk.bf16.mxu1 %vm619_vm0, %v618_v0  ;;  %v41_v2 = vld [vmem:[%s708_s3 + $0x8] sm:$0xff]  ;;  %vm46_vm1 = vcmask 64512   ;;  %v567_v4 = vld [vmem:[#allocation2] sm:$0xff]   ;;  %vm145_vm2 = vcmask 261120   ;;  %v571_v9 = vld [vmem:[#allocation2 + $0x38] sm:$0xff]  }
   0xf   :  { %514 = vmatpush3.bf16.msra.mxu1 %v566_v1  ;;  %508 = vmatprep.subr.mxu0 %v41_v2  ;;  %v35_v5 = vld [vmem:[%s706_s1 + $0x8] sm:$0xff]  ;;  %v568_v7 = vld [vmem:[%s705_s0] sm:$0xff]   ;;  %v572_v10 = vld [vmem:[#allocation2 + $0x30] sm:$0xff]  }
  0x10   :  { %515 = vmatprep.subr.bf16.mxu1 %v618_v0  ;;  %509 = vmatpush3.msra.mxu0 %v41_v2  ;;  %v569_v6 = vld [vmem:[#allocation2 + $0x48] sm:$0xff]   ;;  %v570_v8 = vld [vmem:[#allocation2 + $0x40] sm:$0xff]   ;;  %v575_v13 = vld [vmem:[#allocation2 + $0x18] sm:$0xff]  }
  0x11   :  { %510 = vmatprep.mubr.msk.f32.mxu0 %vm46_vm1, %v34_v3  ;;  %521 = vmatprep.subr.bf16.mxu0 %v618_v0  ;;  %v573_v11 = vld [vmem:[#allocation2 + $0x28] sm:$0xff]   ;;  %v574_v12 = vld [vmem:[#allocation2 + $0x20] sm:$0xff]   ;;  %v576_v14 = vld [vmem:[#allocation2 + $0x10] sm:$0xff]  }
  0x12   :  { %511 = vmatmul.mubr.msk.f32.vlgmr.msra.gmra.mxu0 %vm46_vm1, %v35_v5  ;;  %v577_v15 = vld [vmem:[#allocation2 + $0x88] sm:$0xff]   ;;  %v578_v16 = vld [vmem:[#allocation2 + $0x80] sm:$0xff]   ;;  %v579_v17 = vld [vmem:[#allocation2 + $0x78] sm:$0xff]  }
  0x13   :  { %516 = vmatpush3.bf16.msra.mxu1 %v567_v4  ;;  %522 = vmatpush3.bf16.msra.mxu0 %v569_v6  ;;  %v580_v18 = vld [vmem:[#allocation2 + $0x70] sm:$0xff]   ;;  %v581_v19 = vld [vmem:[#allocation2 + $0x68] sm:$0xff]   ;;  %v461_v24 = vld [vmem:[%s708_s3] ss:$0 sm:$0xff] }
  0x14   :  { %523 = vmatprep.subr.bf16.mxu0 %v618_v0  ;;  %537 = vmatprep.mubr.msk.bf16.mxu0 %vm619_vm0, %v618_v0  ;;  %v582_v34 = vld [vmem:[#allocation2 + $0x60] sm:$0xff]   ;;  %v583_v35 = vld [vmem:[#allocation2 + $0x58] sm:$0xff]   ;;  %v584_v36 = vld [vmem:[#allocation2 + $0x50] sm:$0xff]  }
  0x15   :  { %541 = vmatprep.subr.bf16.mxu1 %v618_v0  ;;  %v462_v37 = vld [vmem:[%s708_s3 + $0x1] ss:$0 sm:$0xff]  ;;  %v471_v47 = vld [vmem:[%s708_s3 + $0x2] ss:$0 sm:$0xff]  ;;  %v482_v62 = vld [vmem:[%s708_s3 + $0x3] ss:$0 sm:$0xff] }
  0x16   :  { %518 = vmatmul.mubr.msk.bf16.vlgmr.msra.gmra.mxu1 %vm145_vm2, %v568_v7  ;;  %v483_v63 = vld [vmem:[%s708_s3 + $0x4] ss:$0 sm:$0xff] }
  0x17   :  { %524 = vmatpush3.bf16.msra.mxu0 %v570_v8  ;;  %557 = vmatprep.mubr.msk.bf16.mxu1 %vm619_vm0, %v618_v0 }
  0x18   :  { %525 = vmatprep.subr.bf16.mxu0 %v618_v0  ;;  %542 = vmatpush3.bf16.msra.mxu1 %v577_v15 }
  0x19   :  { %543 = vmatprep.subr.bf16.mxu1 %v618_v0 }
  0x1b   :  { %526 = vmatpush3.bf16.msra.mxu0 %v571_v9 }
  0x1c   :  { %527 = vmatprep.subr.bf16.mxu0 %v618_v0  ;;  %544 = vmatpush3.bf16.msra.mxu1 %v578_v16 }
  0x1d   :  { %545 = vmatprep.subr.bf16.mxu1 %v618_v0 }
  0x1f   :  { %528 = vmatpush3.bf16.msra.mxu0 %v572_v10 }
  0x20   :  { %529 = vmatprep.subr.bf16.mxu0 %v618_v0  ;;  %546 = vmatpush3.bf16.msra.mxu1 %v579_v17 }
  0x21   :  { %547 = vmatprep.subr.bf16.mxu1 %v618_v0 }
  0x23   :  { %530 = vmatpush3.bf16.msra.mxu0 %v573_v11 }
  0x24   :  { %531 = vmatprep.subr.bf16.mxu0 %v618_v0  ;;  %548 = vmatpush3.bf16.msra.mxu1 %v580_v18 }
  0x25   :  { %549 = vmatprep.subr.bf16.mxu1 %v618_v0 }
  0x27   :  { %532 = vmatpush3.bf16.msra.mxu0 %v574_v12 }
  0x28   :  { %533 = vmatprep.subr.bf16.mxu0 %v618_v0  ;;  %550 = vmatpush3.bf16.msra.mxu1 %v581_v19 }
  0x29   :  { %551 = vmatprep.subr.bf16.mxu1 %v618_v0 }
  0x2b   :  { %534 = vmatpush3.bf16.msra.mxu0 %v575_v13 }
  0x2c   :  { %535 = vmatprep.subr.bf16.mxu0 %v618_v0  ;;  %552 = vmatpush3.bf16.msra.mxu1 %v582_v34 }
  0x2d   :  { %553 = vmatprep.subr.bf16.mxu1 %v618_v0 }
  0x2f   :  { %536 = vmatpush3.bf16.msra.mxu0 %v576_v14 }
  0x30   :  { %554 = vmatpush3.bf16.msra.mxu1 %v583_v35 }
  0x31   :  { %555 = vmatprep.subr.bf16.mxu1 %v618_v0 }
  0x34   :  { %556 = vmatpush3.bf16.msra.mxu1 %v584_v36 }
  0xd2   :  { %v512_v20 = vpop.f32.mrf.mxu0 }
  0xd4   :  { %v119_v21 = vpop.f32.mrf.mxu0 }
  0xd6   :  { %v183_v22 = vpop.f32.mrf.mxu1 }
  0xd7   :  { %v184_v23 = vadd.f32 %v183_v22, %v119_v21 }
  0xd8   :  { %v519_v25 = vpop.f32.mrf.mxu1 }
  0xd9   :  { %v194_v27 = vadd.f32 %v461_v24, %v184_v23 }
  0xda   :  { %v186_v26 = vpop.f32.mrf.mxu1 }
  0xdb   :  { %v187_v28 = vadd.f32 %v512_v20, %v186_v26  ;;  %v196_v31 = vmax.f32 %v194_v27, 0.0  ;;  %v438_v1 = vmul.f32 %v482_v62, %v194_v27 }
  0xdc   :  { %v520_v29 = vpop.f32.mrf.mxu1 }
  0xdd   :  { %v195_v30 = vadd.f32 %v461_v24, %v187_v28 }
  0xdf   :  { %v197_v32 = vmax.f32 %v195_v30, 0.0  ;;  %v439_v5 = vmul.f32 %v482_v62, %v195_v30 }
  0xe1   :  { %v198_v33 = vpack.c.bf16 %v197_v32, %v196_v31 }
  0xe3   :  { %538 = vmatmul.mubr.bf16.vlgmr.msra.gmra.mxu0 %v198_v33 }
 0x1a3   :  { %v301_v38 = vpop.f32.mrf.mxu0 }
 0x1a4   :  { %v302_v40 = vadd.f32 %v462_v37, %v301_v38 }
 0x1a5   :  { %v539_v39 = vpop.f32.mrf.mxu0 }
 0x1a6   :  { %v308_v44 = vmax.f32 %v302_v40, 0.0 }
 0x1a7   :  { %v304_v41 = vpop.f32.mrf.mxu0 }
 0x1a8   :  { %v305_v42 = vadd.f32 %v462_v37, %v304_v41 }
 0x1a9   :  { %v540_v43 = vpop.f32.mrf.mxu0 }
 0x1aa   :  { %v309_v45 = vmax.f32 %v305_v42, 0.0 }
 0x1ac   :  { %v310_v46 = vpack.c.bf16 %v309_v45, %v308_v44 }
 0x1ae   :  { %558 = vmatmul.mubr.bf16.vlgmr.msra.gmra.mxu1 %v310_v46 }
 0x26e   :  { %v413_v48 = vpop.f32.mrf.mxu1 }
 0x26f   :  { %v414_v49 = vadd.f32 %v471_v47, %v413_v48 }
 0x270   :  { %v559_v50 = vpop.f32.mrf.mxu1 }
 0x271   :  { %v420_v51 = vadd.f32 %v414_v49, %v194_v27 }
 0x272   :  { %v416_v52 = vpop.f32.mrf.mxu1 }
 0x273   :  { %v480_v53 = vmul.f32 -1.442695, %v420_v51  ;;  %v417_v54 = vadd.f32 %v471_v47, %v416_v52 }
 0x274   :  { %v560_v55 = vpop.f32.mrf.mxu1 }
 0x275   :  { %585 = vpow2.f32 %v480_v53  ;;  %v421_v56 = vadd.f32 %v417_v54, %v195_v30 }
 0x277   :  { %v481_v57 = vmul.f32 -1.442695, %v421_v56 }
 0x279   :  { %587 = vpow2.f32 %v481_v57 }
 0x282   :  { %v586_v58 = vpop.eup %585 }
 0x283   :  { %v428_v59 = vadd.f32 1.0, %v586_v58 }
 0x285   :  { %589 = vrcp.f32 %v428_v59 }
 0x286   :  { %v588_v60 = vpop.eup %587 }
 0x287   :  { %v429_v61 = vadd.f32 1.0, %v588_v60 }
 0x289   :  { %591 = vrcp.f32 %v429_v61 }
 0x292   :  { %v590_v0 = vpop.eup %589 }
 0x293   :  { %v444_v2 = vmul.f32 %v590_v0, %v483_v63 }
 0x295   :  { %v446_v3 = vadd.f32 %v444_v2, %v438_v1 }
 0x296   :  { %v592_v4 = vpop.eup %591 }
 0x297   :  { %448 = vst [vmem:[%s709_s4] sm:$0xff] %v446_v3  ;;  %v445_v6 = vmul.f32 %v592_v4, %v483_v63 }
 0x299   :  { %v447_v7 = vadd.f32 %v445_v6, %v439_v5 }
 0x29b   :  { %449 = vst [vmem:[%s709_s4 + $0x8] sm:$0xff] %v447_v7 }
 0x29c   :  { %454 = vsyncpa [#allocation3], 1 }

</bundles_post_ra>
